<compile_context>
chip_gen: v7x
topology: tpu7x:2x2x1
jax: 0.10.0
libtpu: 0.0.40
codegen_flags: <defaults>
</compile_context>

<pallas_src>
import functools

import jax
import jax.numpy as jnp
from jax.experimental import pallas as pl
from jax.experimental.pallas import tpu as pltpu


def recommended_compute_dtype():
    """bf16 EUP roughly doubles exp throughput on v6e/v7x; v5e has no bf16
    VPU/EUP so stay f32.  Only the exp/rcp input is cast inside the kernel, so
    the accuracy cost is ~bf16 rounding of the kernel value per pixel."""
    try:
        kind = jax.devices()[0].device_kind.lower()
    except Exception:
        return jnp.float32
    return jnp.bfloat16 if ("v6" in kind or "v7" in kind) else jnp.float32


def _hist_kernel(gt_ref, pred_ref, c_ref, hgt_ref, hpred_ref, *,
                 t, kernel, hw, tile, n_lane_chunks, needs_mask,
                 compute_dtype, approx):
    # grid = (split, batch, hw_tile)
    #   gt_ref/pred_ref : (1, 1, tile)     pixel tile for this grid step
    #   c_ref           : (1, bins, 1)     per-sample histogram centers
    #   hgt/hpred refs  : (1, 1, bins, 128) lane-dense accumulators; same block
    #                     for every k step -> VMEM-resident (P3 accumulator).
    s_id = pl.program_id(0)
    k_id = pl.program_id(2)
    n_k = pl.num_programs(2)

    @pl.when(k_id == 0)
    def _init():
        hgt_ref[...] = jnp.zeros_like(hgt_ref)
        hpred_ref[...] = jnp.zeros_like(hpred_ref)

    bins = c_ref.shape[1]
    c = c_ref[0]                                   # (bins, 1) f32, loaded once

    # Kernel constants with sign/scale folded (no per-element negates, and the
    # cauchy 100*(d/t)^2 becomes (scale*d)^2 via a cheap (1,128)/(bins,1) scale).
    if kernel == "laplacian":
        neg_inv_t = -1.0 / (t + 1e-10)
    elif kernel == "cauchy":
        scale = 10.0 / (t + 1e-10)
        c = c * scale                              # pre-scaled centers (bins, 1)
    else:  # gaussian (default)
        neg_inv_t2 = -1.0 / (t * t)

    tile_start = (s_id * n_k + k_id) * tile        # first pixel of this tile

    def chunk(j, carry):
        acc_g, acc_p = carry
        off = pl.multiple_of(j * 128, 128)

        if needs_mask:
            lane = jax.lax.broadcasted_iota(jnp.int32, (1, 128), 1)
            valid = (lane + (tile_start + off)) < hw          # (1, 128)

        def one(x_ref, acc):
            x = x_ref[0, :, pl.ds(off, 128)]                  # (1, 128) f32
            if kernel == "laplacian":
                d = x - c                                     # (bins, 128)
                arg = jnp.abs(d) * neg_inv_t
                s = jnp.exp(arg.astype(compute_dtype))        # EUP (bf16 on v6e+)
            elif kernel == "cauchy":
                d = x * scale - c                             # pre-scaled sub
                q = d * d + 1.0
                s = pl.reciprocal(q.astype(compute_dtype), approx=approx)
            else:  # gaussian
                d = x - c
                arg = (d * d) * neg_inv_t2
                s = jnp.exp(arg.astype(compute_dtype))
            # Tail kept in f32 for accuracy (review correctness concern):
            # exponent formed in f32 above, only the EUP input was cast.
            s = s.astype(jnp.float32)
            denom = jnp.sum(s, axis=0, keepdims=True) + 1e-10  # (1, 128), XLU
            inv = pl.reciprocal(denom, approx=approx)          # 1 EUP rcp / pixel
            if needs_mask:
                inv = jnp.where(valid, inv, 0.0)               # padded pixels: no mass
            return acc + s * inv                               # (bins, 128)

        return one(gt_ref, acc_g), one(pred_ref, acc_p)

    zero = jnp.zeros((bins, 128), jnp.float32)
    acc_g, acc_p = jax.lax.fori_loop(0, n_lane_chunks, chunk, (zero, zero),
                                     unroll=min(4, n_lane_chunks))
    hgt_ref[0, 0] = hgt_ref[0, 0] + acc_g
    hpred_ref[0, 0] = hpred_ref[0, 0] + acc_p
    # TODO(synk): optional MXU offload of the pixel reduction (dot with an
    # inv column) if profiling still shows VALU/vst binding on v5e.


def _soft_histograms(gt_flat, pred_flat, centers, *, t, kernel, tile, hw,
                     n_splits, compute_dtype, approx_reciprocal):
    B, _, hw_pad = gt_flat.shape
    bins = centers.shape[1]
    n_tiles_per_split = hw_pad // (n_splits * tile)
    n_lane_chunks = tile // 128
    needs_mask = hw_pad != hw

    kern = functools.partial(
        _hist_kernel, t=float(t), kernel=kernel, hw=hw, tile=tile,
        n_lane_chunks=n_lane_chunks, needs_mask=needs_mask,
        compute_dtype=compute_dtype, approx=approx_reciprocal)

    out_gt, out_pred = pl.pallas_call(
        kern,
        out_shape=(
            jax.ShapeDtypeStruct((n_splits, B, bins, 128), jnp.float32),
            jax.ShapeDtypeStruct((n_splits, B, bins, 128), jnp.float32),
        ),
        grid=(n_splits, B, n_tiles_per_split),
        in_specs=[
            pl.BlockSpec((1, 1, tile),
                         lambda s, b, k: (b, 0, s * n_tiles_per_split + k)),
            pl.BlockSpec((1, 1, tile),
                         lambda s, b, k: (b, 0, s * n_tiles_per_split + k)),
            pl.BlockSpec((1, bins, 1), lambda s, b, k: (b, 0, 0)),
        ],
        out_specs=(
            pl.BlockSpec((1, 1, bins, 128), lambda s, b, k: (s, b, 0, 0)),
            pl.BlockSpec((1, 1, bins, 128), lambda s, b, k: (s, b, 0, 0)),
        ),
        compiler_params=pltpu.CompilerParams(
            # split axis + batch axis shard across TensorCores (v7x megacore);
            # the HW reduction axis is last / "arbitrary".
            dimension_semantics=("parallel", "parallel", "arbitrary"),
            # Working set is tiny now (double-buffered input tiles only);
            # 32 MiB is within every generation's scoped ceiling.
            vmem_limit_bytes=32 * 1024 * 1024),
    )(gt_flat, pred_flat, centers)
    # tiny (n_splits, B, bins, 128) -> (B, bins) reduce in plain JAX
    return out_gt.sum(axis=(0, -1)), out_pred.sum(axis=(0, -1))


def _default_tile(hw, n_splits):
    # Only the double-buffered (1,1,tile) f32 inputs live in VMEM (~16*tile
    # bytes), so a 16K-pixel tile is safe on every generation and amortizes
    # the ~0.35us/step grid overhead.
    hw_lanes = ((hw + 127) // 128) * 128
    per_split = -(-hw_lanes // n_splits)
    per_split = ((per_split + 127) // 128) * 128
    return max(128, min(16384, per_split))


def _centers(gt, bins):
    # Replicates HistLoss.__centers__:
    #   linspace(0, max_b, steps=int(max_b)+1), zero-padded (or cropped) to `bins`.
    B = gt.shape[0]
    maxs = jnp.max(gt.reshape(B, -1), axis=1)                      # (B,)
    n = jnp.floor(maxs).astype(jnp.int32)                          # int(max.item())
    k = jnp.arange(bins, dtype=jnp.int32)[None, :]                 # (1, bins)
    valid = (k <= n[:, None]) & (n[:, None] >= 1)
    step = maxs[:, None] / jnp.maximum(n[:, None], 1).astype(gt.dtype)
    centers = jnp.where(valid, k.astype(gt.dtype) * step, 0.0)
    return centers.reshape(B, bins, 1)


def hist1d_loss(gt, pred, mask=None, *, bins, t, kernel="gaussian",
                tile=None, n_splits=None, compute_dtype=jnp.float32,
                approx_reciprocal=True, return_hists=False):
    # TODO(synk): interpolate=True path (bilinear F.interpolate) not implemented.
    # compute_dtype=jnp.bfloat16 (see recommended_compute_dtype) is the fast
    # setting on v6e/v7x; float32 default matches torch most closely.
    if mask is not None:
        gt = gt * mask
        pred = pred * mask
    B, C, H, W = gt.shape
    assert C == 1, "Hist1D_loss expects single-channel depth maps"
    gt = gt.astype(jnp.float32)
    pred = pred.astype(jnp.float32)
    hw = H * W

    if n_splits is None:
        # v7x has 2 TensorCores; for B == 1 the batch axis alone leaves one
        # idle, so split the pixel range in two. Harmless on single-TC chips.
        n_splits = 2 if B == 1 else 1
    if tile is None:
        tile = _default_tile(hw, n_splits)
    assert tile % 128 == 0 and tile >= 128, "tile must be a positive multiple of 128"

    n_tiles_total = -(-hw // tile)
    n_tiles_per_split = -(-n_tiles_total // n_splits)
    hw_pad = n_splits * n_tiles_per_split * tile

    centers = _centers(gt, bins)                                   # (B, bins, 1)
    gt_f = gt.reshape(B, 1, hw)
    pred_f = pred.reshape(B, 1, hw)
    if hw_pad != hw:
        pad = ((0, 0), (0, 0), (0, hw_pad - hw))
        gt_f = jnp.pad(gt_f, pad)     # padded pixels are masked inside the kernel
        pred_f = jnp.pad(pred_f, pad)

    h_gt, h_pred = _soft_histograms(
        gt_f, pred_f, centers, t=t, kernel=kernel, tile=tile, hw=hw,
        n_splits=n_splits, compute_dtype=compute_dtype,
        approx_reciprocal=approx_reciprocal)

    def cdf(h):
        # cumsum over bins, normalized by total mass over the whole (B, bins)
        # tensor — matches torch `h.sum(axis=[-1, -2], keepdims=True)`.
        return jnp.cumsum(h, axis=1) / jnp.sum(h)

    hg, hp = cdf(h_gt), cdf(h_pred)
    loss = jnp.mean(jnp.sum(jnp.abs(hg - hp), axis=1))             # EMD
    if return_hists:
        return loss, h_gt, h_pred
    return loss


def _reference(gt, pred, *, bins, t, kernel="gaussian"):
    # pure-JAX mirror of the PyTorch forward for validation
    B, C, H, W = gt.shape
    centers = _centers(gt, bins).reshape(B, bins, 1, 1)

    def est(img):
        d = img - centers                                          # (B, bins, H, W)
        if kernel == "laplacian":
            s = jnp.exp(-jnp.abs(d) / (t + 1e-10))
        elif kernel == "cauchy":
            s = 1.0 / (1.0 + 100.0 * jnp.square(d / (t + 1e-10)))
        else:
            s = jnp.exp(-jnp.square(d) / (t * t))
        return s / (jnp.sum(s, axis=1, keepdims=True) + 1e-10)

    h_gt = est(gt).sum(axis=(2, 3))
    h_pred = est(pred).sum(axis=(2, 3))

    def cdf(h):
        return jnp.cumsum(h, axis=1) / jnp.sum(h)

    loss = jnp.mean(jnp.sum(jnp.abs(cdf(h_gt) - cdf(h_pred)), axis=1))
    return loss, h_gt, h_pred


if __name__ == "__main__":
    # args analog: t=1.0, bins=16, kernel='gaussian'
    BINS, T = 16, 1.0
    # HW = 640 with tile=256 exercises the multi-tile accumulator (3 HW steps),
    # the multi-chunk inner fori_loop (2 lane chunks/tile) and the masked
    # padded tail (640 -> 768).
    B, C, H, W = 2, 1, 16, 40

    key = jax.random.PRNGKey(0)
    kg, kp = jax.random.split(key)
    gt = jax.random.uniform(kg, (B, C, H, W), jnp.float32, minval=0.1, maxval=9.9)
    pred = jax.random.uniform(kp, (B, C, H, W), jnp.float32, minval=0.1, maxval=9.9)

    loss, h_gt, h_pred = hist1d_loss(gt, pred, bins=BINS, t=T, kernel="gaussian",
                                     tile=256, return_hists=True)
    loss = jax.block_until_ready(loss)
    ref_loss, ref_hg, ref_hp = _reference(gt, pred, bins=BINS, t=T, kernel="gaussian")
    ref_loss = jax.block_until_ready(ref_loss)

    assert bool(jnp.isfinite(loss)), "loss is not finite"
    assert bool(jnp.allclose(h_gt, ref_hg, rtol=1e-2, atol=5e-2)), "gt histogram mismatch"
    assert bool(jnp.allclose(h_pred, ref_hp, rtol=1e-2, atol=5e-2)), "pred histogram mismatch"
    assert abs(float(loss) - float(ref_loss)) < 2e-2, (float(loss), float(ref_loss))

    # laplacian / cauchy branches: compile and match the reference loss.
    for kname in ("laplacian", "cauchy"):
        l = hist1d_loss(gt, pred, bins=BINS, t=T, kernel=kname, tile=256)
        l = jax.block_until_ready(l)
        rl, _, _ = _reference(gt, pred, bins=BINS, t=T, kernel=kname)
        assert bool(jnp.isfinite(l)), kname
        assert abs(float(l) - float(rl)) < 5e-2, (kname, float(l), float(rl))

    # B == 1 exercises the 2-way TensorCore split of the pixel axis (v7x path,
    # (2, 1, bins, 128) partial-histogram slots summed in the epilogue).
    l1, hg1, hp1 = hist1d_loss(gt[:1], pred[:1], bins=BINS, t=T, kernel="gaussian",
                               tile=256, return_hists=True)
    l1 = jax.block_until_ready(l1)
    rl1, rhg1, rhp1 = _reference(gt[:1], pred[:1], bins=BINS, t=T, kernel="gaussian")
    assert bool(jnp.allclose(hg1, rhg1, rtol=1e-2, atol=5e-2)), "split gt hist mismatch"
    assert bool(jnp.allclose(hp1, rhp1, rtol=1e-2, atol=5e-2)), "split pred hist mismatch"
    assert abs(float(l1) - float(rl1)) < 2e-2, (float(l1), float(rl1))

    print("KERNEL_OK")
</pallas_src>

<mosaic_0001>
module attributes {stable_mosaic.version = 11 : i64} {
  func.func @_hist_kernel(%arg0: i32, %arg1: i32, %arg2: i32, %arg3: memref<1x1x256xf32, #tpu.memory_space<vmem>>, %arg4: memref<1x1x256xf32, #tpu.memory_space<vmem>>, %arg5: memref<1x16x1xf32, #tpu.memory_space<vmem>>, %arg6: memref<1x1x16x128xf32, #tpu.memory_space<vmem>>, %arg7: memref<1x1x16x128xf32, #tpu.memory_space<vmem>>) attributes {dimension_semantics = [#tpu.dimension_semantics<parallel>, #tpu.dimension_semantics<parallel>, #tpu.dimension_semantics<arbitrary>], iteration_bounds = array<i64: 1, 2, 3>, scalar_prefetch = 0 : i64, scratch_operands = 0 : i64, tpu.core_type = #tpu.core_type<tc>, window_params = [{transform_indices = @transform_0, window_bounds = array<i64: 1, 1, 256>}, {transform_indices = @transform_1, window_bounds = array<i64: 1, 1, 256>}, {transform_indices = @transform_2, window_bounds = array<i64: 1, 16, 1>}, {transform_indices = @transform_3, window_bounds = array<i64: 1, 1, 16, 128>}, {transform_indices = @transform_4, window_bounds = array<i64: 1, 1, 16, 128>}]} {
    %c0_i32 = arith.constant 0 : i32
    %0 = arith.cmpi eq, %arg2, %c0_i32 : i32
    %1 = arith.extui %0 : i1 to i32
    %c0_i32_0 = arith.constant 0 : i32
    %2 = arith.cmpi ne, %1, %c0_i32_0 : i32
    scf.if %2 {
      %cst_46 = arith.constant 0.000000e+00 : f32
      %117 = vector.broadcast %cst_46 : f32 to vector<1x1x16x128xf32>
      %c0_47 = arith.constant 0 : index
      %c0_48 = arith.constant 0 : index
      %c0_49 = arith.constant 0 : index
      %c0_50 = arith.constant 0 : index
      %118 = vector.load %arg6[%c0_47, %c0_48, %c0_49, %c0_50] : memref<1x1x16x128xf32, #tpu.memory_space<vmem>>, vector<1x1x16x128xf32>
      tpu.vector_store %arg6[%c0_47, %c0_48, %c0_49, %c0_50], %117 {strides = array<i32>} : memref<1x1x16x128xf32, #tpu.memory_space<vmem>>, vector<1x1x16x128xf32>,
      %cst_51 = arith.constant 0.000000e+00 : f32
      %119 = vector.broadcast %cst_51 : f32 to vector<1x1x16x128xf32>
      %c0_52 = arith.constant 0 : index
      %c0_53 = arith.constant 0 : index
      %c0_54 = arith.constant 0 : index
      %c0_55 = arith.constant 0 : index
      %120 = vector.load %arg7[%c0_52, %c0_53, %c0_54, %c0_55] : memref<1x1x16x128xf32, #tpu.memory_space<vmem>>, vector<1x1x16x128xf32>
      tpu.vector_store %arg7[%c0_52, %c0_53, %c0_54, %c0_55], %119 {strides = array<i32>} : memref<1x1x16x128xf32, #tpu.memory_space<vmem>>, vector<1x1x16x128xf32>,
    } else {
    }
    %c0 = arith.constant 0 : index
    %c0_1 = arith.constant 0 : index
    %c0_2 = arith.constant 0 : index
    %3 = vector.load %arg5[%c0, %c0_1, %c0_2] : memref<1x16x1xf32, #tpu.memory_space<vmem>>, vector<1x16x1xf32>
    %4 = vector.shape_cast %3 : vector<1x16x1xf32> to vector<16x1xf32>
    %c3_i32 = arith.constant 3 : i32
    %5 = arith.muli %arg0, %c3_i32 : i32
    %6 = arith.addi %5, %arg2 : i32
    %c256_i32 = arith.constant 256 : i32
    %7 = arith.muli %6, %c256_i32 : i32
    %cst = arith.constant 0.000000e+00 : f32
    %8 = vector.broadcast %cst : f32 to vector<16x128xf32>
    %c0_i32_3 = arith.constant 0 : i32
    %c128_i32 = arith.constant 128 : i32
    %9 = arith.muli %c0_i32_3, %c128_i32 : i32
    %10 = tpu.assume_multiple %9, 128 : i32
    %11 = tpu.iota {dimensions = array<i32: 1>} : vector<1x128xi32>
    %12 = arith.addi %7, %10 : i32
    %13 = vector.broadcast %12 : i32 to vector<1x128xi32>
    %14 = arith.addi %11, %13 : vector<1x128xi32>
    %c640_i32 = arith.constant 640 : i32
    %15 = vector.broadcast %c640_i32 : i32 to vector<1x128xi32>
    %16 = arith.cmpi slt, %14, %15 : vector<1x128xi32>
    %c0_4 = arith.constant 0 : index
    %c0_5 = arith.constant 0 : index
    %17 = arith.index_cast %10 : i32 to index
    %18 = vector.load %arg3[%c0_4, %c0_5, %17] : memref<1x1x256xf32, #tpu.memory_space<vmem>>, vector<1x1x128xf32>
    %19 = vector.shape_cast %18 : vector<1x1x128xf32> to vector<1x128xf32>
    %20 = vector.broadcast %19 : vector<1x128xf32> to vector<16x128xf32>
    %21 = vector.broadcast %4 : vector<16x1xf32> to vector<16x128xf32>
    %22 = arith.subf %20, %21 : vector<16x128xf32>
    %23 = arith.mulf %22, %22 : vector<16x128xf32>
    %cst_6 = arith.constant -1.000000e+00 : f32
    %24 = vector.broadcast %cst_6 : f32 to vector<16x128xf32>
    %25 = arith.mulf %23, %24 : vector<16x128xf32>
    %26 = math.exp %25 : vector<16x128xf32>
    %cst_7 = arith.constant dense<0.000000e+00> : vector<128xf32>
    %27 = vector.multi_reduction <add>, %26, %cst_7 [0] : vector<16x128xf32> to vector<128xf32>
    %28 = vector.shape_cast %27 : vector<128xf32> to vector<1x128xf32>
    %cst_8 = arith.constant 1.000000e-10 : f32
    %29 = vector.broadcast %cst_8 : f32 to vector<1x128xf32>
    %30 = arith.addf %28, %29 : vector<1x128xf32>
    %31 = tpu.reciprocal %30 {approx = true} : vector<1x128xf32> -> vector<1x128xf32>
    %cst_9 = arith.constant 0.000000e+00 : f32
    %32 = vector.broadcast %cst_9 : f32 to vector<1x128xf32>
    %33 = arith.select %16, %31, %32 : vector<1x128xi1>, vector<1x128xf32>
    %34 = vector.broadcast %33 : vector<1x128xf32> to vector<16x128xf32>
    %35 = arith.mulf %26, %34 : vector<16x128xf32>
    %36 = arith.addf %8, %35 : vector<16x128xf32>
    %c0_10 = arith.constant 0 : index
    %c0_11 = arith.constant 0 : index
    %37 = arith.index_cast %10 : i32 to index
    %38 = vector.load %arg4[%c0_10, %c0_11, %37] : memref<1x1x256xf32, #tpu.memory_space<vmem>>, vector<1x1x128xf32>
    %39 = vector.shape_cast %38 : vector<1x1x128xf32> to vector<1x128xf32>
    %40 = vector.broadcast %39 : vector<1x128xf32> to vector<16x128xf32>
    %41 = vector.broadcast %4 : vector<16x1xf32> to vector<16x128xf32>
    %42 = arith.subf %40, %41 : vector<16x128xf32>
    %43 = arith.mulf %42, %42 : vector<16x128xf32>
    %cst_12 = arith.constant -1.000000e+00 : f32
    %44 = vector.broadcast %cst_12 : f32 to vector<16x128xf32>
    %45 = arith.mulf %43, %44 : vector<16x128xf32>
    %46 = math.exp %45 : vector<16x128xf32>
    %cst_13 = arith.constant dense<0.000000e+00> : vector<128xf32>
    %47 = vector.multi_reduction <add>, %46, %cst_13 [0] : vector<16x128xf32> to vector<128xf32>
    %48 = vector.shape_cast %47 : vector<128xf32> to vector<1x128xf32>
    %cst_14 = arith.constant 1.000000e-10 : f32
    %49 = vector.broadcast %cst_14 : f32 to vector<1x128xf32>
    %50 = arith.addf %48, %49 : vector<1x128xf32>
    %51 = tpu.reciprocal %50 {approx = true} : vector<1x128xf32> -> vector<1x128xf32>
    %cst_15 = arith.constant 0.000000e+00 : f32
    %52 = vector.broadcast %cst_15 : f32 to vector<1x128xf32>
    %53 = arith.select %16, %51, %52 : vector<1x128xi1>, vector<1x128xf32>
    %54 = vector.broadcast %53 : vector<1x128xf32> to vector<16x128xf32>
    %55 = arith.mulf %46, %54 : vector<16x128xf32>
    %56 = arith.addf %8, %55 : vector<16x128xf32>
    %c1_i32 = arith.constant 1 : i32
    %c128_i32_16 = arith.constant 128 : i32
    %57 = arith.muli %c1_i32, %c128_i32_16 : i32
    %58 = tpu.assume_multiple %57, 128 : i32
    %59 = tpu.iota {dimensions = array<i32: 1>} : vector<1x128xi32>
    %60 = arith.addi %7, %58 : i32
    %61 = vector.broadcast %60 : i32 to vector<1x128xi32>
    %62 = arith.addi %59, %61 : vector<1x128xi32>
    %c640_i32_17 = arith.constant 640 : i32
    %63 = vector.broadcast %c640_i32_17 : i32 to vector<1x128xi32>
    %64 = arith.cmpi slt, %62, %63 : vector<1x128xi32>
    %c0_18 = arith.constant 0 : index
    %c0_19 = arith.constant 0 : index
    %65 = arith.index_cast %58 : i32 to index
    %66 = vector.load %arg3[%c0_18, %c0_19, %65] : memref<1x1x256xf32, #tpu.memory_space<vmem>>, vector<1x1x128xf32>
    %67 = vector.shape_cast %66 : vector<1x1x128xf32> to vector<1x128xf32>
    %68 = vector.broadcast %67 : vector<1x128xf32> to vector<16x128xf32>
    %69 = vector.broadcast %4 : vector<16x1xf32> to vector<16x128xf32>
    %70 = arith.subf %68, %69 : vector<16x128xf32>
    %71 = arith.mulf %70, %70 : vector<16x128xf32>
    %cst_20 = arith.constant -1.000000e+00 : f32
    %72 = vector.broadcast %cst_20 : f32 to vector<16x128xf32>
    %73 = arith.mulf %71, %72 : vector<16x128xf32>
    %74 = math.exp %73 : vector<16x128xf32>
    %cst_21 = arith.constant dense<0.000000e+00> : vector<128xf32>
    %75 = vector.multi_reduction <add>, %74, %cst_21 [0] : vector<16x128xf32> to vector<128xf32>
    %76 = vector.shape_cast %75 : vector<128xf32> to vector<1x128xf32>
    %cst_22 = arith.constant 1.000000e-10 : f32
    %77 = vector.broadcast %cst_22 : f32 to vector<1x128xf32>
    %78 = arith.addf %76, %77 : vector<1x128xf32>
    %79 = tpu.reciprocal %78 {approx = true} : vector<1x128xf32> -> vector<1x128xf32>
    %cst_23 = arith.constant 0.000000e+00 : f32
    %80 = vector.broadcast %cst_23 : f32 to vector<1x128xf32>
    %81 = arith.select %64, %79, %80 : vector<1x128xi1>, vector<1x128xf32>
    %82 = vector.broadcast %81 : vector<1x128xf32> to vector<16x128xf32>
    %83 = arith.mulf %74, %82 : vector<16x128xf32>
    %84 = arith.addf %36, %83 : vector<16x128xf32>
    %c0_24 = arith.constant 0 : index
    %c0_25 = arith.constant 0 : index
    %85 = arith.index_cast %58 : i32 to index
    %86 = vector.load %arg4[%c0_24, %c0_25, %85] : memref<1x1x256xf32, #tpu.memory_space<vmem>>, vector<1x1x128xf32>
    %87 = vector.shape_cast %86 : vector<1x1x128xf32> to vector<1x128xf32>
    %88 = vector.broadcast %87 : vector<1x128xf32> to vector<16x128xf32>
    %89 = vector.broadcast %4 : vector<16x1xf32> to vector<16x128xf32>
    %90 = arith.subf %88, %89 : vector<16x128xf32>
    %91 = arith.mulf %90, %90 : vector<16x128xf32>
    %cst_26 = arith.constant -1.000000e+00 : f32
    %92 = vector.broadcast %cst_26 : f32 to vector<16x128xf32>
    %93 = arith.mulf %91, %92 : vector<16x128xf32>
    %94 = math.exp %93 : vector<16x128xf32>
    %cst_27 = arith.constant dense<0.000000e+00> : vector<128xf32>
    %95 = vector.multi_reduction <add>, %94, %cst_27 [0] : vector<16x128xf32> to vector<128xf32>
    %96 = vector.shape_cast %95 : vector<128xf32> to vector<1x128xf32>
    %cst_28 = arith.constant 1.000000e-10 : f32
    %97 = vector.broadcast %cst_28 : f32 to vector<1x128xf32>
    %98 = arith.addf %96, %97 : vector<1x128xf32>
    %99 = tpu.reciprocal %98 {approx = true} : vector<1x128xf32> -> vector<1x128xf32>
    %cst_29 = arith.constant 0.000000e+00 : f32
    %100 = vector.broadcast %cst_29 : f32 to vector<1x128xf32>
    %101 = arith.select %64, %99, %100 : vector<1x128xi1>, vector<1x128xf32>
    %102 = vector.broadcast %101 : vector<1x128xf32> to vector<16x128xf32>
    %103 = arith.mulf %94, %102 : vector<16x128xf32>
    %104 = arith.addf %56, %103 : vector<16x128xf32>
    %c2_i32 = arith.constant 2 : i32
    %c0_30 = arith.constant 0 : index
    %c0_31 = arith.constant 0 : index
    %c0_32 = arith.constant 0 : index
    %c0_33 = arith.constant 0 : index
    %105 = vector.load %arg6[%c0_30, %c0_31, %c0_32, %c0_33] : memref<1x1x16x128xf32, #tpu.memory_space<vmem>>, vector<1x1x16x128xf32>
    %106 = vector.shape_cast %105 : vector<1x1x16x128xf32> to vector<16x128xf32>
    %107 = arith.addf %106, %84 : vector<16x128xf32>
    %c0_34 = arith.constant 0 : index
    %c0_35 = arith.constant 0 : index
    %c0_36 = arith.constant 0 : index
    %c0_37 = arith.constant 0 : index
    %108 = vector.load %arg6[%c0_34, %c0_35, %c0_36, %c0_37] : memref<1x1x16x128xf32, #tpu.memory_space<vmem>>, vector<1x1x16x128xf32>
    %109 = vector.shape_cast %108 : vector<1x1x16x128xf32> to vector<16x128xf32>
    %110 = vector.shape_cast %107 : vector<16x128xf32> to vector<1x1x16x128xf32>
    tpu.vector_store %arg6[%c0_34, %c0_35, %c0_36, %c0_37], %110 {strides = array<i32>} : memref<1x1x16x128xf32, #tpu.memory_space<vmem>>, vector<1x1x16x128xf32>,
    %c0_38 = arith.constant 0 : index
    %c0_39 = arith.constant 0 : index
    %c0_40 = arith.constant 0 : index
    %c0_41 = arith.constant 0 : index
    %111 = vector.load %arg7[%c0_38, %c0_39, %c0_40, %c0_41] : memref<1x1x16x128xf32, #tpu.memory_space<vmem>>, vector<1x1x16x128xf32>
    %112 = vector.shape_cast %111 : vector<1x1x16x128xf32> to vector<16x128xf32>
    %113 = arith.addf %112, %104 : vector<16x128xf32>
    %c0_42 = arith.constant 0 : index
    %c0_43 = arith.constant 0 : index
    %c0_44 = arith.constant 0 : index
    %c0_45 = arith.constant 0 : index
    %114 = vector.load %arg7[%c0_42, %c0_43, %c0_44, %c0_45] : memref<1x1x16x128xf32, #tpu.memory_space<vmem>>, vector<1x1x16x128xf32>
    %115 = vector.shape_cast %114 : vector<1x1x16x128xf32> to vector<16x128xf32>
    %116 = vector.shape_cast %113 : vector<16x128xf32> to vector<1x1x16x128xf32>
    tpu.vector_store %arg7[%c0_42, %c0_43, %c0_44, %c0_45], %116 {strides = array<i32>} : memref<1x1x16x128xf32, #tpu.memory_space<vmem>>, vector<1x1x16x128xf32>,
    return
  }
  func.func @transform_0(%arg0: i32, %arg1: i32, %arg2: i32) -> (i32, i32, i32) {
    %c3_i32 = arith.constant 3 : i32
    %0 = arith.muli %arg0, %c3_i32 : i32
    %1 = arith.addi %0, %arg2 : i32
    %c0_i32 = arith.constant 0 : i32
    %c0_i32_0 = arith.constant 0 : i32
    return %arg1, %c0_i32, %1 : i32, i32, i32
  }
  func.func @transform_1(%arg0: i32, %arg1: i32, %arg2: i32) -> (i32, i32, i32) {
    %c3_i32 = arith.constant 3 : i32
    %0 = arith.muli %arg0, %c3_i32 : i32
    %1 = arith.addi %0, %arg2 : i32
    %c0_i32 = arith.constant 0 : i32
    %c0_i32_0 = arith.constant 0 : i32
    return %arg1, %c0_i32, %1 : i32, i32, i32
  }
  func.func @transform_2(%arg0: i32, %arg1: i32, %arg2: i32) -> (i32, i32, i32) {
    %c0_i32 = arith.constant 0 : i32
    %c0_i32_0 = arith.constant 0 : i32
    %c0_i32_1 = arith.constant 0 : i32
    return %arg1, %c0_i32, %c0_i32_0 : i32, i32, i32
  }
  func.func @transform_3(%arg0: i32, %arg1: i32, %arg2: i32) -> (i32, i32, i32, i32) {
    %c0_i32 = arith.constant 0 : i32
    %c0_i32_0 = arith.constant 0 : i32
    %c0_i32_1 = arith.constant 0 : i32
    return %arg0, %arg1, %c0_i32, %c0_i32_0 : i32, i32, i32, i32
  }
  func.func @transform_4(%arg0: i32, %arg1: i32, %arg2: i32) -> (i32, i32, i32, i32) {
    %c0_i32 = arith.constant 0 : i32
    %c0_i32_0 = arith.constant 0 : i32
    %c0_i32_1 = arith.constant 0 : i32
    return %arg0, %arg1, %c0_i32, %c0_i32_0 : i32, i32, i32, i32
  }
}

</mosaic_0001>

<bundles_post_ra>
// kernel: tpu_custom_call.1
= control target key start
LH: loop header
LB: loop body
LE: loop exit
PB: predicated region body
PF: predicated region fallthrough
CT: control target
= control target key end

     0   :  { %10 = vsyncpa [#allocation3], 0  ;;  %s1187_s0 = inlined_call_operand.vmem [shape: f32[2,1,768], index: 0, kind: input, shape index: {}]   ;;  %s1188_s1 = inlined_call_operand.vmem [shape: f32[2,1,768], index: 1, kind: input, shape index: {}]   ;;  %s1189_s2 = inlined_call_operand.vmem [shape: f32[2,16,1], index: 2, kind: input, shape index: {}]   ;;  %s1190_s3 = inlined_call_operand.hbm [shape: f32[1,2,16,128], index: 3, kind: output, shape index: {0}]   ;;  %s1191_s4 = inlined_call_operand.hbm [shape: f32[1,2,16,128], index: 4, kind: output, shape index: {1}]  }
   0x1   :  { %12 = vsyncpa [#allocation3 + $0x1], 0 }
   0x2   :  { %13 = vsyncpa [#allocation5], 0 }
   0x3   :  { %15 = vsyncpa [#allocation5 + $0x1], 0  ;;  %s973_s15 = smov 0   ;;  %s975_s16 = smov 0  }
   0x4   :  { %s977_s17 = smov 0   ;;  %s979_s18 = smov 0  }
   0x5   :  { %s981_s19 = smov 0   ;;  %s983_s20 = smov 0  }
   0x6   :  { %s985_s21 = smov 0   ;;  %s987_s22 = smov 0  }
   0x7 LB: > { %1195 = sst [smem:[#allocation8_spill]] %s932_s20  ;;  %s678_s23 = sadd.s32 4294967295, %s940_s22   ;;  %s940_s22 = sphi %s987_s22, %s21_s22   ;;  %s936_s21 = sphi %s985_s21, %s1206_s21   ;;  %s932_s20 = sphi %s983_s20, %s1205_s20   ;;  %s928_s19 = sphi %s981_s19, %s1204_s19   ;;  %s924_s18 = sphi %s979_s18, %s1203_s18   ;;  %s920_s17 = sphi %s977_s17, %s1209_s17   ;;  %s916_s16 = sphi %s975_s16, %s1208_s16   ;;  %s912_s15 = sphi %s973_s15, %s1207_s15  }
   0x8   : > { %1196 = sst [smem:[#allocation9_spill]] %s936_s21  ;;  %s679_s24 = sadd.s32 4294967294, %s940_s22  }
   0x9   : > { %s33_s25 = sadd.s32 1, %s932_s20  ;;  %s36_s26 = sadd.s32 1, %s936_s21 }
   0xa   : > { %p34_p0 = scmp.ge.s32.totalorder %s33_s25, 3  ;;  %p149_p1 = scmp.ne.s32.totalorder %s920_s17, %s916_s16 }
   0xb   : > { %p150_p2 = scmp.eq.s32.totalorder %s678_s23, 5  ;;  %p155_p4 = scmp.ne.s32.totalorder %s916_s16, %s912_s15 }
   0xc   : > { %s1211_s25 = smov (%p34_p0, %s33_s25), 0  ;;  %s1213_s26 = smov (!%p34_p0, %s36_s26), %s936_s21 }
   0xd   : > { %1197 = sst [smem:[#allocation10_spill]] %s1211_s25  ;;  %p1022_p3 = por %p150_p2, %p149_p1 }
   0xe   : > { %p38_p5 = scmp.ge.s32.totalorder %s1213_s26, 2  ;;  %p156_p6 = scmp.eq.s32.totalorder %s679_s24, 5 }
   0xf   : > { %p682_p7 = scmp.ge.s32.totalorder %s940_s22, 1  ;;  %p242_p8 = scmp.lt.s32.totalorder %s940_s22, 7 }
  0x10   : > { %s1215_s26 = smov (%p38_p5, %s1213_s26), 0  ;;  %p1032_p9 = por %p156_p6, %p155_p4 }
  0x11   : > { %1199 = sst [smem:[#allocation11_spill]] %s1215_s26  ;;  %p243_p10 = pnand %p682_p7, %p242_p8 }
  0x12   : > { %s135_s29 = ssub.s32 %s936_s21, %s1215_s26  ;;  %s139_s30 = sadd.s32 1, %s920_s17 }
  0x13   : > { %p137_p11 = scmp.eq.s32.totalorder %s135_s29, 0  ;;  %246 = sbr.rel (%p243_p10) target bundleno = 262 (0x106), region = 32 }
  0x14   : > { %s1043_s6 = sand.u32 (!%p243_p10), 1, %s916_s16   ;;  %s685_s7 = sshll.u32 (!%p243_p10), %s924_s18, 1 }
  0x15   : > { %s1040_s5 = scalar_select %p137_p11, %s920_s17, %s139_s30  }
  0x16   : > { %s683_s8 = sshll.u32 (!%p243_p10), %s1043_s6, 4  ;;  %p296_p12 = scmp.lt.s32.totalorder (!%p243_p10), %s928_s19, 1 }
  0x17   : > { %1201 = sst [smem:[#allocation12_spill]] %s1040_s5  ;;  %p298_p13 = scmp.lt.s32.totalorder (!%p243_p10), %s685_s7, 5 }
  0x18   : > { %s1058_s20 = scalar_lea.vmem (!%p243_p10), [#allocation2], %s683_s8  ;;  %s1060_s5 = scalar_lea.vmem (!%p243_p10), [#allocation4], %s683_s8 }
  0x19   : > { %p689_p0 = scmp.ne.s32.totalorder (!%p243_p10), %s924_s18, 0 }
  0x1a   : > { %s297_s9 = scalar_select %p296_p12, %s928_s19, 1 }
  0x1b   : > { %s1217_s7 = smov (!%p298_p13, %s685_s7), 5  ;;  %327 = sbr.rel (%p689_p0) target bundleno = 34 (0x22), region = 36 }
  0x1c   : > { %s708_s10 = smul.u32 6, %s297_s9  ;;  %s705_s11 = sshll.u32 %s297_s9, 4  ;;  %v942_v0 = vmov (!%p689_p0), 0.0  }
  0x1d   : > { %s323_s14 = scalar_lea.vmem %s1189_s2, %s705_s11  ;;  %328 = vst [vmem:[%s1058_s20] sm:$0xff] (!%p689_p0), %v942_v0  ;;  %329 = vst [vmem:[%s1058_s20 + $0x8] sm:$0xff] (!%p689_p0), %v942_v0 }
  0x1e   : > { %s301_s23 = sadd.s32 %s708_s10, %s1217_s7  ;;  %330 = vst [vmem:[%s1060_s5] sm:$0xff] (!%p689_p0), %v942_v0  ;;  %331 = vst [vmem:[%s1060_s5 + $0x8] sm:$0xff] (!%p689_p0), %v942_v0 }
  0x1f   : > { %s302_s30 = scalar_lea.vmem %s1187_s0, %s301_s23  ;;  %s315_s21 = scalar_lea.vmem %s1188_s1, %s301_s23 }
  0x22 PF: > { %v332_v1 = vld [vmem:[%s323_s14] sm:$0xff]  ;;  %v943_v2 = vmov 0   ;;  %v333_v3 = vld [vmem:[%s323_s14 + $0x8] sm:$0xff]  ;;  %s516_s26 = sshll.u32 %s1058_s20, 4  ;;  %s534_s9 = sshll.u32 %s1060_s5, 4  ;;  %s1092_s26 = int_to_ptr.vmem [resolvable:$true] %s516_s26  ;;  %s1099_s9 = int_to_ptr.vmem [resolvable:$true] %s534_s9 }
  0x23   : > { %789 = vset.pattern.permute.xlu0 %v943_v2  ;;  %v691_v4 = vld [vmem:[%s302_s30] ss:$0 sm:$0xff]  ;;  %v694_v6 = vld [vmem:[%s302_s30 + $0x1] ss:$0 sm:$0xff]  ;;  %s496_s13 = scalar_lea.sflag [#allocation3], %s1043_s6  ;;  %s814_s14 = scalar_lea.vmem %s1092_s26, 256 }
  0x24   : > { %352 = vperm.xlu0 %789, %v332_v1   ;;  %v692_v5 = vld [vmem:[%s315_s21] ss:$0 sm:$0xff]  ;;  %v696_v7 = vld [vmem:[%s315_s21 + $0x1] ss:$0 sm:$0xff]  ;;  %s690_s21 = sshll.u32 %s924_s18, 8  ;;  %s706_s18 = sshll.u32 %s928_s19, 8 }
  0x25   : > { %s415_s25 = sadd.s32 128, %s690_s21  ;;  %s1087_s19 = scalar_lea.hbm %s1190_s3, %s706_s18 }
  0x26   : > { %s1097_s12 = scalar_lea.hbm %s1191_s4, %s706_s18  ;;  %p815_p1 = scmp.ne.s32.totalorder %s1092_s26, %s814_s14 }
  0x27   : > { %s944_s23 = smov [#allocation2]  }
  0x28   : > { %357 = vperm.xlu0 %789, %v333_v3   ;;  %p816_p2 = pnand %p815_p1, %p1022_p3  ;;  %s818_s24 = sshll.u32 %s944_s23, 4  ;;  %s819_s24 = int_to_ptr.vmem [resolvable:$false] %s818_s24 }
  0x29   : > { %s820_s29 = scalar_lea.vmem %s819_s24, 512  ;;  %p821_p5 = scmp.lt.s32.totalorder %s1092_s26, %s819_s24 }
  0x2a   : > { %p817_p4 = pneg %p816_p2  ;;  %p822_p6 = scmp.lt.s32.totalorder %s820_s29, %s814_s14 }
  0x2c   : > { %p823_p7 = por %p822_p6, %p821_p5 }
  0x2e   : > { %p824_p8 = pnand %p823_p7, %p817_p4 }
  0xa3   : > { %v353_v8 = vpop.permute.xlu0 %352 }
  0xa4   : > { %v360_v9 = vsub.f32 %v691_v4, %v353_v8  ;;  %v391_v10 = vsub.f32 %v692_v5, %v353_v8  ;;  %v427_v11 = vsub.f32 %v694_v6, %v353_v8  ;;  %v459_v12 = vsub.f32 %v696_v7, %v353_v8 }
  0xa5   : > { %v337_v8 = vlaneseq }
  0xa6   : > { %v362_v13 = vmul.f32 %v360_v9, %v360_v9  ;;  %v393_v14 = vmul.f32 %v391_v10, %v391_v10  ;;  %v429_v15 = vmul.f32 %v427_v11, %v427_v11  ;;  %v461_v16 = vmul.f32 %v459_v12, %v459_v12 }
  0xa7   : > { %v358_v17 = vpop.permute.xlu0 %357 }
  0xa8   : > { %v364_v18 = vmul.f32 -1.0, %v362_v13  ;;  %v395_v19 = vmul.f32 -1.0, %v393_v14  ;;  %v431_v20 = vmul.f32 -1.0, %v429_v15  ;;  %v463_v21 = vmul.f32 -1.0, %v461_v16 }
  0xa9   : > { %v361_v22 = vsub.f32 %v691_v4, %v358_v17  ;;  %v392_v23 = vsub.f32 %v692_v5, %v358_v17  ;;  %v428_v24 = vsub.f32 %v694_v6, %v358_v17  ;;  %v460_v25 = vsub.f32 %v696_v7, %v358_v17 }
  0xaa   : > { %v366_v26 = vmul.f32 1.442695, %v364_v18  ;;  %v397_v27 = vmul.f32 1.442695, %v395_v19  ;;  %v433_v28 = vmul.f32 1.442695, %v431_v20  ;;  %v340_v19 = vstv %s690_s21 }
  0xab   : > { %v363_v29 = vmul.f32 %v361_v22, %v361_v22  ;;  %v394_v30 = vmul.f32 %v392_v23, %v392_v23  ;;  %v430_v31 = vmul.f32 %v428_v24, %v428_v24  ;;  %v465_v32 = vmul.f32 1.442695, %v463_v21 }
  0xac   : > { %v462_v33 = vmul.f32 %v460_v25, %v460_v25  ;;  %790 = vpow2.f32 %v366_v26  ;;  %v338_v17 = vand.u32 127, %v337_v8  ;;  %v416_v21 = vstv %s415_s25 }
  0xad   : > { %v365_v34 = vmul.f32 -1.0, %v363_v29  ;;  %v396_v35 = vmul.f32 -1.0, %v394_v30  ;;  %v432_v36 = vmul.f32 -1.0, %v430_v31  ;;  %792 = vpow2.f32 %v397_v27 }
  0xae   : > { %v464_v37 = vmul.f32 -1.0, %v462_v33  ;;  %794 = vpow2.f32 %v433_v28  ;;  %v341_v22 = vadd.s32 %v340_v19, %v338_v17  ;;  %v417_v23 = vadd.s32 %v416_v21, %v338_v17 }
  0xaf   : > { %v368_v38 = vmul.f32 1.442695, %v365_v34  ;;  %v399_v39 = vmul.f32 1.442695, %v396_v35  ;;  %v435_v40 = vmul.f32 1.442695, %v432_v36  ;;  %796 = vpow2.f32 %v465_v32 }
  0xb0   : > { %v467_v41 = vmul.f32 1.442695, %v464_v37  ;;  %vm342_vm0 = vcmp.lt.s32.totalorder %v341_v22, 640  ;;  %vm418_vm1 = vcmp.lt.s32.totalorder %v417_v23, 640 }
  0xb1   : > { %798 = vpow2.f32 %v368_v38 }
  0xb2   : > { %800 = vpow2.f32 %v399_v39  ;;  %v483_v39 = vld [vmem:[%s1058_s20] sm:$0xff] }
  0xb3   : > { %802 = vpow2.f32 %v435_v40  ;;  %v484_v40 = vld [vmem:[%s1058_s20 + $0x8] sm:$0xff] }
  0xb4   : > { %804 = vpow2.f32 %v467_v41 }
  0xb6   : > { %v791_v42 = vpop.eup %790 }
  0xb7   : > { %v1067_v43 = vpop.eup %792 }
  0xb8   : > { %v1069_v44 = vpop.eup %794 }
  0xb9   : > { %v1071_v45 = vpop.eup %796 }
  0xbb   : > { %v799_v46 = vpop.eup %798 }
  0xbc   : > { %v801_v47 = vpop.eup %800  ;;  %v370_v48 = vadd.f32 %v799_v46, %v791_v42 }
  0xbd   : > { %v803_v49 = vpop.eup %802  ;;  %v401_v50 = vadd.f32 %v801_v47, %v1067_v43 }
  0xbe   : > { %v805_v51 = vpop.eup %804  ;;  %v371_v52 = vrot.slane %v370_v48, 4  ;;  %v437_v53 = vadd.f32 %v803_v49, %v1069_v44 }
  0xbf   : > { %v402_v54 = vrot.slane %v401_v50, 4  ;;  %v469_v55 = vadd.f32 %v805_v51, %v1071_v45 }
  0xc0   : > { %v372_v56 = vadd.f32 %v371_v52, %v370_v48  ;;  %v438_v57 = vrot.slane %v437_v53, 4 }
  0xc1   : > { %v403_v58 = vadd.f32 %v402_v54, %v401_v50  ;;  %v470_v59 = vrot.slane %v469_v55, 4 }
  0xc2   : > { %v373_v60 = vrot.slane %v372_v56, 2  ;;  %v439_v61 = vadd.f32 %v438_v57, %v437_v53 }
  0xc3   : > { %v404_v62 = vrot.slane %v403_v58, 2  ;;  %v471_v63 = vadd.f32 %v470_v59, %v469_v55 }
  0xc4   : > { %v374_v0 = vadd.f32 %v373_v60, %v372_v56  ;;  %v440_v1 = vrot.slane %v439_v61, 2 }
  0xc5   : > { %v405_v2 = vadd.f32 %v404_v62, %v403_v58  ;;  %v472_v3 = vrot.slane %v471_v63, 2 }
  0xc6   : > { %v375_v4 = vrot.slane %v374_v0, 1  ;;  %v441_v5 = vadd.f32 %v440_v1, %v439_v61 }
  0xc7   : > { %v406_v6 = vrot.slane %v405_v2, 1  ;;  %v473_v7 = vadd.f32 %v472_v3, %v471_v63 }
  0xc8   : > { %v376_v9 = vadd.f32 %v375_v4, %v374_v0  ;;  %v442_v10 = vrot.slane %v441_v5, 1 }
  0xc9   : > { %v407_v11 = vadd.f32 %v406_v6, %v405_v2  ;;  %v474_v12 = vrot.slane %v473_v7, 1 }
  0xca   : > { %v377_v13 = vadd.f32 1e-10, %v376_v9  ;;  %v443_v14 = vadd.f32 %v442_v10, %v441_v5 }
  0xcb   : > { %v408_v15 = vadd.f32 1e-10, %v407_v11  ;;  %v475_v16 = vadd.f32 %v474_v12, %v473_v7 }
  0xcc   : > { %806 = vrcp.f32 %v377_v13  ;;  %v444_v18 = vadd.f32 1e-10, %v443_v14 }
  0xcd   : > { %808 = vrcp.f32 %v408_v15  ;;  %v476_v20 = vadd.f32 1e-10, %v475_v16 }
  0xce   : > { %810 = vrcp.f32 %v444_v18 }
  0xcf   : > { %812 = vrcp.f32 %v476_v20 }
  0xd6   : > { %v807_v24 = vpop.eup %806 }
  0xd7   : > { %v809_v25 = vpop.eup %808  ;;  %v379_v26 = vsel %vm342_vm0, %v807_v24, 0.0 }
  0xd8   : > { %v811_v27 = vpop.eup %810  ;;  %v381_v28 = vmul.f32 %v799_v46, %v379_v26  ;;  %v410_v29 = vsel %vm342_vm0, %v809_v25, 0.0  ;;  %v380_v30 = vmul.f32 %v791_v42, %v379_v26 }
  0xd9   : > { %v813_v31 = vpop.eup %812  ;;  %v412_v32 = vmul.f32 %v801_v47, %v410_v29  ;;  %v446_v33 = vsel %vm418_vm1, %v811_v27, 0.0  ;;  %v411_v34 = vmul.f32 %v1067_v43, %v410_v29  ;;  %v489_v43 = vld [vmem:[%s1060_s5] sm:$0xff]  ;;  %v490_v47 = vld [vmem:[%s1060_s5 + $0x8] sm:$0xff] }
  0xda   : > { %v448_v35 = vmul.f32 %v803_v49, %v446_v33  ;;  %v478_v36 = vsel %vm418_vm1, %v813_v31, 0.0  ;;  %v447_v37 = vmul.f32 %v1069_v44, %v446_v33 }
  0xdb   : > { %v480_v38 = vmul.f32 %v805_v51, %v478_v36  ;;  %v479_v41 = vmul.f32 %v1071_v45, %v478_v36 }
  0xdc   : > { %v449_v42 = vadd.f32 %v447_v37, %v380_v30  ;;  %v450_v46 = vadd.f32 %v448_v35, %v381_v28 }
  0xdd   : > { %v481_v44 = vadd.f32 %v479_v41, %v411_v34  ;;  %v482_v45 = vadd.f32 %v480_v38, %v412_v32 }
  0xde   : > { %v485_v48 = vadd.f32 %v483_v39, %v449_v42  ;;  %v486_v49 = vadd.f32 %v484_v40, %v450_v46 }
  0xdf   : > { %v491_v50 = vadd.f32 %v489_v43, %v481_v44  ;;  %v492_v51 = vadd.f32 %v490_v47, %v482_v45 }
  0xe0   : > { %487 = vst [vmem:[%s1058_s20] sm:$0xff] %v485_v48  ;;  %488 = vst [vmem:[%s1058_s20 + $0x8] sm:$0xff] %v486_v49 }
  0xe1   : > { %827 = shalt.err (!%p824_p8)
}
  0xe2   : > { %s828_s20 = scalar_lea.hbm %s1087_s19, 256  ;;  %s832_s25 = scalar_lea.hbm %s1190_s3, 512 }
  0xe3   : > { %p829_p10 = scmp.ne.s32.totalorder %s1087_s19, %s828_s20  ;;  %p833_p13 = scmp.lt.u32.totalorder %s1087_s19, %s1190_s3 }
  0xe4   : > { %p834_p0 = scmp.lt.u32.totalorder %s832_s25, %s828_s20  ;;  %p836_p2 = scmp.lt.u32.totalorder %s828_s20, %s1087_s19 }
  0xe5   : > { %p830_p11 = pnand %p829_p10, %p1022_p3 }
  0xe6   : > { %p835_p1 = por %p834_p0, %p833_p13 }
  0xe7   : > { %p831_p12 = pneg %p830_p11 }
  0xe8   : > { %p837_p4 = por %p836_p2, %p835_p1 }
  0xea   : > { %p838_p5 = pnand %p837_p4, %p831_p12 }
  0xec   : > { %841 = shalt.err (!%p838_p5)
}
  0xed   : > { %s945_s8 = smov 128   ;;  %s946_s10 = smov 8   ;;  %493 = vst [vmem:[%s1060_s5] sm:$0xff] %v491_v50  ;;  %494 = vst [vmem:[%s1060_s5 + $0x8] sm:$0xff] %v492_v51 }
  0xee   : > { %709 = dma.vmem_to_hbm [thread:$0]  (%p1022_p3), %s1092_s26, 256, %s1087_s19, %s496_s13, %s945_s8, %s945_s8, %s946_s10  }
  0xef   : > { %s501_s11 = scalar_lea.sflag [#allocation5], %s1043_s6  ;;  %s842_s14 = scalar_lea.vmem %s1099_s9, 256 }
  0xf0   : > { %p843_p6 = scmp.ne.s32.totalorder %s1099_s9, %s842_s14  ;;  %s947_s23 = smov [#allocation4]  }
  0xf1   : > { %s846_s24 = sshll.u32 %s947_s23, 4  ;;  %s847_s24 = int_to_ptr.vmem [resolvable:$false] %s846_s24 }
  0xf2   : > { %p844_p7 = pnand %p843_p6, %p1022_p3  ;;  %s848_s29 = scalar_lea.vmem %s847_s24, 512 }
  0xf3   : > { %p849_p10 = scmp.lt.s32.totalorder %s1099_s9, %s847_s24  ;;  %p850_p11 = scmp.lt.s32.totalorder %s848_s29, %s842_s14 }
  0xf4   : > { %p845_p8 = pneg %p844_p7 }
  0xf5   : > { %p851_p12 = por %p850_p11, %p849_p10 }
  0xf7   : > { %p852_p13 = pnand %p851_p12, %p845_p8 }
  0xf9   : > { %855 = shalt.err (!%p852_p13)
}
  0xfa   : > { %s856_s5 = scalar_lea.hbm %s1097_s12, 256  ;;  %s860_s13 = scalar_lea.hbm %s1191_s4, 512 }
  0xfb   : > { %p857_p0 = scmp.ne.s32.totalorder %s1097_s12, %s856_s5  ;;  %p861_p4 = scmp.lt.u32.totalorder %s1097_s12, %s1191_s4 }
  0xfc   : > { %p862_p5 = scmp.lt.u32.totalorder %s860_s13, %s856_s5  ;;  %p864_p7 = scmp.lt.u32.totalorder %s856_s5, %s1097_s12 }
  0xfd   : > { %p858_p1 = pnand %p857_p0, %p1022_p3 }
  0xfe   : > { %p863_p6 = por %p862_p5, %p861_p4 }
  0xff   : > { %p859_p2 = pneg %p858_p1 }
 0x100   : > { %p865_p8 = por %p864_p7, %p863_p6 }
 0x102   : > { %p866_p10 = pnand %p865_p8, %p859_p2 }
 0x104   : > { %869 = shalt.err (!%p866_p10)
}
 0x105   : > { %710 = dma.vmem_to_hbm [thread:$0]  (%p1022_p3), %s1099_s9, 256, %s1097_s12, %s501_s11, %s945_s8, %s945_s8, %s946_s10  }
 0x106 PF: > { %p720_p11 = scmp.ge.s32.totalorder %s940_s22, 2  ;;  %s549_s21 = sand.u32 1, %s912_s15  }
 0x107   : > { %s550_s25 = scalar_lea.sflag [#allocation3], %s549_s21 }
 0x108   : > { %p714_p12 = pnand %p720_p11, %p1032_p9 }
 0x10a   : > { %903 = dma.done.wait (!%p714_p12), %s550_s25, 256  }
 0x10b   : > { %905 = vsyncadd (!%p714_p12), %s550_s25, 4294967040  ;;  %s559_s27 = scalar_lea.sflag [#allocation5], %s549_s21 }
 0x10c   : > { %907 = dma.done.wait (!%p714_p12), %s559_s27, 256  }
 0x10d   : > { %909 = vsyncadd (!%p714_p12), %s559_s27, 4294967040  ;;  %s21_s22 = sadd.s32 1, %s940_s22   ;;  %s1202_s6 = sld [smem:[#allocation12_spill]] }
 0x10e   : > { %p18_p13 = scmp.ge.s32.totalorder %s21_s22, 8   ;;  %s1203_s18 = sld [smem:[#allocation8_spill]] }
 0x10f   : > { %s1204_s19 = sld [smem:[#allocation9_spill]]  ;;  %s1205_s20 = sld [smem:[#allocation10_spill]] }
 0x110   : > { %s1206_s21 = sld [smem:[#allocation11_spill]]  ;;  %s1207_s15 = smov %s916_s16 }
 0x111   : > { %s1208_s16 = smov %s920_s17  ;;  %20 = sbr.rel (!%p18_p13) target bundleno = 7 (0x7), region = 96 }
 0x113   : > { %s1209_s17 = smov %s1202_s6 }
 0x118   :  { %564 = vsyncpa [#allocation3], 1 }
 0x119   :  { %566 = vsyncpa [#allocation3 + $0x1], 1 }
 0x11a   :  { %567 = vsyncpa [#allocation5], 1 }
 0x11b   :  { %569 = vsyncpa [#allocation5 + $0x1], 1 }

</bundles_post_ra>
